<compile_context>
chip_gen: v7x
topology: tpu7x:2x2x1
jax: 0.10.0
libtpu: 0.0.40
codegen_flags: <defaults>
</compile_context>

<pallas_src>
import functools

import jax
import jax.numpy as jnp
from jax.experimental import pallas as pl
from jax.experimental.pallas import tpu as pltpu


# ----------------------------------------------------------------------------- helpers
def _round_up(x, m):
    return ((x + m - 1) // m) * m


def _tpu_vmem_capacity_bytes():
    try:
        return int(pltpu.get_tpu_info().vmem_capacity_bytes)
    except Exception:
        return 64 << 20                      # conservative (v7x-sized) fallback


def _device_kind():
    try:
        return jax.devices()[0].device_kind.lower()
    except Exception:
        return ""


def _num_tensorcores():
    k = _device_kind()
    return 2 if ("v7" in k or "7x" in k) else 1


def _has_bf16_vpu():
    k = _device_kind()
    if any(t in k for t in ("v2", "v3", "v4", "v5")):
        return False                         # v5e/v5p and older: no bf16 VALU datapath
    return ("v6" in k) or ("v7" in k) or ("7x" in k)


def _pick_hw_tile(budget_bytes, rows, per_elem_bytes, hw):
    """Largest lane-dense (multiple-of-128) spatial tile that fits the VMEM budget."""
    t = budget_bytes // max(1, rows * per_elem_bytes)
    t = (t // 128) * 128
    t = max(t, 128)
    if t >= hw:
        t = hw                               # full spatial extent: always a legal block dim
    return int(t)


# ----------------------------------------------------------------------------- kernels
def _afb_fused_kernel(high_ref, low_ref,
                      w1h_ref, b1h_ref, w2h_ref, b2h_ref,
                      w1l_ref, b1l_ref, w2l_ref, b2l_ref,
                      out_ref, *, inv_hw, rescale_in_io_dtype):
    # high/low/out: (nb, C, HW) in the caller's dtype.  wX: (C, C) (in, out) with BN
    # folded; bX: (1, C).  Blocks use the exact HW so GAP over the lane axis is exact.
    # GAP accumulated in f32 directly from the native-dtype refs (no resident f32 slab).
    pooled_h = jnp.sum(high_ref[...], axis=-1, dtype=jnp.float32) * inv_hw     # (nb, C)
    pooled_l = jnp.sum(low_ref[...], axis=-1, dtype=jnp.float32) * inv_hw      # (nb, C)

    def branch(pooled, w1t_ref, b1_ref, w2t_ref, b2_ref):
        h = jnp.dot(pooled, w1t_ref[...], preferred_element_type=jnp.float32) + b1_ref[...]
        h = jnp.maximum(h, 0.0)                                                # ReLU
        z = jnp.dot(h, w2t_ref[...], preferred_element_type=jnp.float32) + b2_ref[...]
        return jax.nn.sigmoid(z)                                               # (nb, C) f32

    w_high = branch(pooled_h, w1h_ref, b1h_ref, w2h_ref, b2h_ref)[:, :, None]
    w_low = branch(pooled_l, w1l_ref, b1l_ref, w2l_ref, b2l_ref)[:, :, None]

    if rescale_in_io_dtype:
        # f32 I/O, or bf16 I/O on chips with a bf16 VPU (v6e/v7x): no upcast needed.
        dt = out_ref.dtype
        out_ref[...] = high_ref[...] * w_high.astype(dt) + low_ref[...] * w_low.astype(dt)
    else:
        # e.g. bf16 I/O on v5e (no bf16 VALU): fused upcast -> f32 FMA -> downcast.
        out = (high_ref[...].astype(jnp.float32) * w_high
               + low_ref[...].astype(jnp.float32) * w_low)
        out_ref[...] = out.astype(out_ref.dtype)


def _afb_pool_kernel(high_ref, low_ref, ph_ref, plo_ref, acc_h, acc_l,
                     *, hw, hw_tile, inv_hw):
    # Two-phase path, phase 1: spatially tiled GAP.  Grid = (batch blocks, HW tiles),
    # HW axis is "arbitrary" (reduction); f32 accumulators live in scratch.
    s = pl.program_id(1)

    @pl.when(s == 0)
    def _():
        acc_h[...] = jnp.zeros_like(acc_h)
        acc_l[...] = jnp.zeros_like(acc_l)

    # Mask lanes past the true spatial extent (last tile may be partial -> garbage lanes).
    lane = jax.lax.broadcasted_iota(jnp.int32, high_ref.shape, 2)
    valid = (lane + s * hw_tile) < hw
    acc_h[...] += jnp.sum(jnp.where(valid, high_ref[...], 0), axis=-1, dtype=jnp.float32)
    acc_l[...] += jnp.sum(jnp.where(valid, low_ref[...], 0), axis=-1, dtype=jnp.float32)

    @pl.when(s == pl.num_programs(1) - 1)
    def _():
        ph_ref[...] = acc_h[...] * inv_hw
        plo_ref[...] = acc_l[...] * inv_hw


def _afb_apply_kernel(wh_ref, wl_ref, high_ref, low_ref, out_ref, *, rescale_in_io_dtype):
    # Two-phase path, phase 2: purely elementwise per-(sample, channel) rescale + add,
    # 2-D ("parallel", "parallel") grid over (batch, lane-dense HW tiles).
    if rescale_in_io_dtype:
        dt = out_ref.dtype
        out_ref[...] = (high_ref[...] * wh_ref[...].astype(dt)
                        + low_ref[...] * wl_ref[...].astype(dt))
    else:
        out = (high_ref[...].astype(jnp.float32) * wh_ref[...]
               + low_ref[...].astype(jnp.float32) * wl_ref[...])
        out_ref[...] = out.astype(out_ref.dtype)


# ----------------------------------------------------------------------------- wrapper
def afb_pallas(input_high, input_low, params, *, two_phase=None,
               slab_budget_bytes=None, vmem_limit_bytes=None, max_nb=64):
    """AFB forward.  input_high/input_low: (N, C, H, W), f32 or bf16.  Same-dtype output."""
    N, C, H, W = input_high.shape
    assert input_low.shape == (N, C, H, W)
    dtype = input_high.dtype
    HW = H * W
    itemsize = jnp.dtype(dtype).itemsize

    # Generation-aware VMEM budgets.
    cap = _tpu_vmem_capacity_bytes()
    if slab_budget_bytes is None:
        slab_budget_bytes = (cap * 3) // 4           # ~96 MiB on v5e/v6e, ~48 MiB on v7x
    if vmem_limit_bytes is None:
        vmem_limit_bytes = (cap * 7) // 8

    num_tc = _num_tensorcores()
    rescale_in_io_dtype = (itemsize == 4) or _has_bf16_vpu()
    comp_item = itemsize if rescale_in_io_dtype else 4

    # Per-sample resident VMEM: double-buffered high/low/out slabs (native dtype) plus a
    # conservative allowance for the Mosaic elementwise temporaries of the fused rescale
    # (whole-block values can be VMEM-backed).  Sublane/lane padding included.
    # TODO(synk): collapse (nb, C) into one second-minor dim ((N*C, HW) layout) to kill the
    # sublane padding when C is small / dtype is bf16.
    sub = 32 // itemsize                              # sublane tile: 8 (f32) / 16 (bf16)
    c_pad = _round_up(C, sub)
    unit = c_pad * _round_up(HW, 128)
    per_sample = unit * (2 * 3 * itemsize + 3 * comp_item)

    if two_phase is None:
        two_phase = per_sample > slab_budget_bytes

    # Tiny params stay f32; BN is already folded.  w: (in, out) pre-transposed, b: (1, out).
    (w1h, b1h, w2h, b2h, w1l, b1l, w2l, b2l) = [jnp.asarray(p, jnp.float32) for p in params]

    high = input_high.reshape(N, C, HW)               # pure reshape, no HBM copy
    low = input_low.reshape(N, C, HW)
    inv_hw = float(1.0 / HW)
    cparams = dict(vmem_limit_bytes=int(vmem_limit_bytes))

    if not two_phase:
        # ---------------- single-pass fused kernel (GAP + MLP + rescale) ----------------
        nb = int(max(1, min(max_nb, N, slab_budget_bytes // max(per_sample, 1))))
        if num_tc > 1 and N >= num_tc:
            nb = min(nb, -(-N // num_tc))              # >= num_tc parallel grid steps (v7x)

        data_spec = pl.BlockSpec((nb, C, HW), lambda b: (b, 0, 0))
        wmat_spec = pl.BlockSpec((C, C), lambda b: (0, 0))        # resident, tiny
        bvec_spec = pl.BlockSpec((1, C), lambda b: (0, 0))

        out = pl.pallas_call(
            functools.partial(_afb_fused_kernel, inv_hw=inv_hw,
                              rescale_in_io_dtype=rescale_in_io_dtype),
            out_shape=jax.ShapeDtypeStruct((N, C, HW), dtype),
            grid_spec=pltpu.PrefetchScalarGridSpec(
                num_scalar_prefetch=0,
                grid=(pl.cdiv(N, nb),),
                in_specs=[data_spec, data_spec,
                          wmat_spec, bvec_spec, wmat_spec, bvec_spec,
                          wmat_spec, bvec_spec, wmat_spec, bvec_spec],
                out_specs=data_spec),
            compiler_params=pltpu.CompilerParams(
                dimension_semantics=("parallel",), **cparams),
            cost_estimate=pl.CostEstimate(
                flops=4 * N * C * HW + 8 * N * C * C,
                transcendentals=4 * N * C,
                bytes_accessed=3 * N * C * HW * itemsize),
        )(high, low, w1h, b1h, w2h, b2h, w1l, b1l, w2l, b2l)
        return out.reshape(N, C, H, W)

    # ---------------- two-phase fallback: tiled GAP reduce + elementwise apply ----------
    # Phase 1: per-(sample, channel) means via a spatially tiled Pallas reduction.
    nb_p = min(N, 8)                                   # 8-row blocks keep the (8,128) rule
    hw_tile_p = _pick_hw_tile(slab_budget_bytes, nb_p * c_pad, 4 * itemsize + 16, HW)
    pool_in_spec = pl.BlockSpec((nb_p, C, hw_tile_p), lambda b, s: (b, 0, s))
    pool_out_spec = pl.BlockSpec((nb_p, C), lambda b, s: (b, 0))

    pooled_h, pooled_l = pl.pallas_call(
        functools.partial(_afb_pool_kernel, hw=HW, hw_tile=hw_tile_p, inv_hw=inv_hw),
        out_shape=(jax.ShapeDtypeStruct((N, C), jnp.float32),
                   jax.ShapeDtypeStruct((N, C), jnp.float32)),
        grid_spec=pltpu.PrefetchScalarGridSpec(
            num_scalar_prefetch=0,
            grid=(pl.cdiv(N, nb_p), pl.cdiv(HW, hw_tile_p)),
            in_specs=[pool_in_spec, pool_in_spec],
            out_specs=(pool_out_spec, pool_out_spec),
            scratch_shapes=[pltpu.VMEM((nb_p, C), jnp.float32),
                            pltpu.VMEM((nb_p, C), jnp.float32)]),
        compiler_params=pltpu.CompilerParams(
            dimension_semantics=("parallel", "arbitrary"), **cparams),
        cost_estimate=pl.CostEstimate(
            flops=2 * N * C * HW, transcendentals=0,
            bytes_accessed=2 * N * C * HW * itemsize),
    )(high, low)

    # Tiny squeeze-excite MLP on (N, C): negligible work, plain JAX (not worth a kernel).
    def branch(pooled, w1t, b1, w2t, b2):
        h = jnp.maximum(pooled @ w1t + b1, 0.0)
        return jax.nn.sigmoid(h @ w2t + b2)

    w_high = branch(pooled_h, w1h, b1h, w2h, b2h)[:, :, None]      # (N, C, 1) f32
    w_low = branch(pooled_l, w1l, b1l, w2l, b2l)[:, :, None]

    # Phase 2: elementwise apply with large lane-dense tiles, fully parallel 2-D grid.
    nb_a = 1
    hw_tile_a = _pick_hw_tile(slab_budget_bytes, nb_a * c_pad,
                              2 * 3 * itemsize + 3 * comp_item, HW)
    data_spec_a = pl.BlockSpec((nb_a, C, hw_tile_a), lambda b, s: (b, 0, s))
    wvec_spec = pl.BlockSpec((nb_a, C, 1), lambda b, s: (b, 0, 0))

    out = pl.pallas_call(
        functools.partial(_afb_apply_kernel, rescale_in_io_dtype=rescale_in_io_dtype),
        out_shape=jax.ShapeDtypeStruct((N, C, HW), dtype),
        grid_spec=pltpu.PrefetchScalarGridSpec(
            num_scalar_prefetch=0,
            grid=(pl.cdiv(N, nb_a), pl.cdiv(HW, hw_tile_a)),
            in_specs=[wvec_spec, wvec_spec, data_spec_a, data_spec_a],
            out_specs=data_spec_a),
        compiler_params=pltpu.CompilerParams(
            dimension_semantics=("parallel", "parallel"), **cparams),
        cost_estimate=pl.CostEstimate(
            flops=3 * N * C * HW, transcendentals=0,
            bytes_accessed=3 * N * C * HW * itemsize),
    )(w_high, w_low, high, low)
    return out.reshape(N, C, H, W)


# ------------------------------------------------------------------- params & reference
def _fold_bn(w, b, gamma, beta, mean, var, eps=1e-5):
    """Fold eval-mode BatchNorm into a preceding 1x1 conv (w: (out,in), b: (out,)).

    Returns the weight pre-transposed to (in, out) and the bias as a (1, out) row —
    the layouts the kernels consume directly.
    """
    scale = gamma / jnp.sqrt(var + eps)
    w_f = w * scale[:, None]
    b_f = scale * (b - mean) + beta
    return w_f.T, b_f[None, :]


def make_params(key, mid_ch, out_ch):
    """Deterministic synthetic parameters matching AFB.__init__ shapes (BN folded)."""
    ks = jax.random.split(key, 13)

    def conv_bn(kw, kb, kg, kbeta, km, kv, cin, cout):
        w = jax.random.normal(kw, (cout, cin), jnp.float32) * 0.2
        b = jax.random.normal(kb, (cout,), jnp.float32) * 0.05
        gamma = 1.0 + 0.1 * jax.random.normal(kg, (cout,), jnp.float32)
        beta = 0.05 * jax.random.normal(kbeta, (cout,), jnp.float32)
        mean = 0.05 * jax.random.normal(km, (cout,), jnp.float32)
        var = 1.0 + 0.1 * jax.nn.softplus(jax.random.normal(kv, (cout,), jnp.float32))
        return _fold_bn(w, b, gamma, beta, mean, var)

    # conv1 branch: mid_ch -> out_ch -> out_ch
    w1h, b1h = conv_bn(ks[0], ks[1], ks[2], ks[3], ks[4], ks[5], mid_ch, out_ch)
    w2h, b2h = conv_bn(ks[6], ks[7], ks[8], ks[9], ks[10], ks[11], out_ch, out_ch)
    # conv2 branch: out_ch -> out_ch -> out_ch
    ks2 = jax.random.split(ks[12], 12)
    w1l, b1l = conv_bn(ks2[0], ks2[1], ks2[2], ks2[3], ks2[4], ks2[5], out_ch, out_ch)
    w2l, b2l = conv_bn(ks2[6], ks2[7], ks2[8], ks2[9], ks2[10], ks2[11], out_ch, out_ch)
    return (w1h, b1h, w2h, b2h, w1l, b1l, w2l, b2l)


def afb_reference(input_high, input_low, params):
    """Pure-JAX reference (weights stored as (in,out), bias (1,out))."""
    (w1h, b1h, w2h, b2h, w1l, b1l, w2l, b2l) = params
    ph = jnp.mean(input_high, axis=(2, 3))             # (N, C)
    plow = jnp.mean(input_low, axis=(2, 3))

    def branch(x, w1t, b1, w2t, b2):
        h = jnp.maximum(x @ w1t + b1, 0.0)
        return jax.nn.sigmoid(h @ w2t + b2)

    wh = branch(ph, w1h, b1h, w2h, b2h)[:, :, None, None]
    wl = branch(plow, w1l, b1l, w2l, b2l)[:, :, None, None]
    return input_high * wh + input_low * wl


if __name__ == "__main__":
    # In LWANet usage mid_ch == out_ch is required for the broadcasted multiply.
    N, C, H, W = 2, 8, 16, 16
    key = jax.random.PRNGKey(0)
    k_high, k_low, k_params, k_h2, k_l2 = jax.random.split(key, 5)

    input_high = jax.random.normal(k_high, (N, C, H, W), jnp.float32)
    input_low = jax.random.normal(k_low, (N, C, H, W), jnp.float32)
    params = make_params(k_params, C, C)
    ref = afb_reference(input_high, input_low, params)

    # 1) float32 I/O, fused single-pass path (auto-selected at these shapes)
    out = jax.block_until_ready(afb_pallas(input_high, input_low, params))
    assert out.shape == (N, C, H, W) and out.dtype == jnp.float32
    assert jnp.allclose(out, ref, atol=1e-5, rtol=1e-5), "f32 fused mismatch vs reference"

    # 2) bf16 I/O (half the HBM bytes; GAP/MLP math stays f32 in the kernel)
    out_bf16 = jax.block_until_ready(
        afb_pallas(input_high.astype(jnp.bfloat16),
                   input_low.astype(jnp.bfloat16), params))
    assert out_bf16.dtype == jnp.bfloat16
    assert jnp.allclose(out_bf16.astype(jnp.float32), ref, atol=8e-2, rtol=5e-2), \
        "bf16 fused mismatch vs reference"

    # 3) two-phase fallback, forced with a tiny VMEM budget and a non-128-aligned H*W so
    #    the masked-GAP / partial-tile paths are exercised on-hardware.
    H2 = W2 = 18
    input_high2 = jax.random.normal(k_h2, (N, C, H2, W2), jnp.float32)
    input_low2 = jax.random.normal(k_l2, (N, C, H2, W2), jnp.float32)
    ref2 = afb_reference(input_high2, input_low2, params)
    out2 = jax.block_until_ready(
        afb_pallas(input_high2, input_low2, params,
                   two_phase=True, slab_budget_bytes=1 << 16))
    assert out2.shape == (N, C, H2, W2)
    assert jnp.allclose(out2, ref2, atol=1e-5, rtol=1e-5), "two-phase mismatch vs reference"

    print("KERNEL_OK")
</pallas_src>

<mosaic_0001>
module attributes {stable_mosaic.version = 11 : i64} {
  func.func @_afb_fused_kernel(%arg0: i32, %arg1: memref<2x8x256xf32, #tpu.memory_space<vmem>>, %arg2: memref<2x8x256xf32, #tpu.memory_space<vmem>>, %arg3: memref<8x8xf32, #tpu.memory_space<vmem>>, %arg4: memref<1x8xf32, #tpu.memory_space<vmem>>, %arg5: memref<8x8xf32, #tpu.memory_space<vmem>>, %arg6: memref<1x8xf32, #tpu.memory_space<vmem>>, %arg7: memref<8x8xf32, #tpu.memory_space<vmem>>, %arg8: memref<1x8xf32, #tpu.memory_space<vmem>>, %arg9: memref<8x8xf32, #tpu.memory_space<vmem>>, %arg10: memref<1x8xf32, #tpu.memory_space<vmem>>, %arg11: memref<2x8x256xf32, #tpu.memory_space<vmem>>) attributes {dimension_semantics = [#tpu.dimension_semantics<parallel>], iteration_bounds = array<i64: 1>, scalar_prefetch = 0 : i64, scratch_operands = 0 : i64, tpu.core_type = #tpu.core_type<tc>, window_params = [{transform_indices = @transform_0, window_bounds = array<i64: 2, 8, 256>}, {transform_indices = @transform_1, window_bounds = array<i64: 2, 8, 256>}, {pipeline_mode = #tpu.pipeline_mode<synchronous>, transform_indices = @transform_2, window_bounds = array<i64: 8, 8>}, {pipeline_mode = #tpu.pipeline_mode<synchronous>, transform_indices = @transform_3, window_bounds = array<i64: 1, 8>}, {pipeline_mode = #tpu.pipeline_mode<synchronous>, transform_indices = @transform_4, window_bounds = array<i64: 8, 8>}, {pipeline_mode = #tpu.pipeline_mode<synchronous>, transform_indices = @transform_5, window_bounds = array<i64: 1, 8>}, {pipeline_mode = #tpu.pipeline_mode<synchronous>, transform_indices = @transform_6, window_bounds = array<i64: 8, 8>}, {pipeline_mode = #tpu.pipeline_mode<synchronous>, transform_indices = @transform_7, window_bounds = array<i64: 1, 8>}, {pipeline_mode = #tpu.pipeline_mode<synchronous>, transform_indices = @transform_8, window_bounds = array<i64: 8, 8>}, {pipeline_mode = #tpu.pipeline_mode<synchronous>, transform_indices = @transform_9, window_bounds = array<i64: 1, 8>}, {transform_indices = @transform_10, window_bounds = array<i64: 2, 8, 256>}]} {
    %c0 = arith.constant 0 : index
    %c0_0 = arith.constant 0 : index
    %c0_1 = arith.constant 0 : index
    %0 = vector.load %arg1[%c0, %c0_0, %c0_1] : memref<2x8x256xf32, #tpu.memory_space<vmem>>, vector<2x8x256xf32>
    %cst = arith.constant dense<0.000000e+00> : vector<2x8xf32>
    %1 = vector.multi_reduction <add>, %0, %cst [2] : vector<2x8x256xf32> to vector<2x8xf32>
    %cst_2 = arith.constant 3.906250e-03 : f32
    %2 = vector.broadcast %cst_2 : f32 to vector<2x8xf32>
    %3 = arith.mulf %1, %2 : vector<2x8xf32>
    %c0_3 = arith.constant 0 : index
    %c0_4 = arith.constant 0 : index
    %c0_5 = arith.constant 0 : index
    %4 = vector.load %arg2[%c0_3, %c0_4, %c0_5] : memref<2x8x256xf32, #tpu.memory_space<vmem>>, vector<2x8x256xf32>
    %cst_6 = arith.constant dense<0.000000e+00> : vector<2x8xf32>
    %5 = vector.multi_reduction <add>, %4, %cst_6 [2] : vector<2x8x256xf32> to vector<2x8xf32>
    %cst_7 = arith.constant 3.906250e-03 : f32
    %6 = vector.broadcast %cst_7 : f32 to vector<2x8xf32>
    %7 = arith.mulf %5, %6 : vector<2x8xf32>
    %c0_8 = arith.constant 0 : index
    %c0_9 = arith.constant 0 : index
    %8 = vector.load %arg3[%c0_8, %c0_9] : memref<8x8xf32, #tpu.memory_space<vmem>>, vector<8x8xf32>
    %cst_10 = arith.constant dense<0.000000e+00> : vector<2x8xf32>
    %9 = tpu.matmul %3, %8, %cst_10 {dimension_numbers = #tpu.dot_dimension_numbers<[1], [0], [0], [1], [0, 0, 1, 1], [], []>} : vector<2x8xf32>, vector<8x8xf32>, vector<2x8xf32> -> vector<2x8xf32>
    %c0_11 = arith.constant 0 : index
    %c0_12 = arith.constant 0 : index
    %10 = vector.load %arg4[%c0_11, %c0_12] : memref<1x8xf32, #tpu.memory_space<vmem>>, vector<1x8xf32>
    %11 = vector.broadcast %10 : vector<1x8xf32> to vector<2x8xf32>
    %12 = arith.addf %9, %11 : vector<2x8xf32>
    %cst_13 = arith.constant 0.000000e+00 : f32
    %13 = vector.broadcast %cst_13 : f32 to vector<2x8xf32>
    %14 = arith.maximumf %12, %13 : vector<2x8xf32>
    %c0_14 = arith.constant 0 : index
    %c0_15 = arith.constant 0 : index
    %15 = vector.load %arg5[%c0_14, %c0_15] : memref<8x8xf32, #tpu.memory_space<vmem>>, vector<8x8xf32>
    %cst_16 = arith.constant dense<0.000000e+00> : vector<2x8xf32>
    %16 = tpu.matmul %14, %15, %cst_16 {dimension_numbers = #tpu.dot_dimension_numbers<[1], [0], [0], [1], [0, 0, 1, 1], [], []>} : vector<2x8xf32>, vector<8x8xf32>, vector<2x8xf32> -> vector<2x8xf32>
    %c0_17 = arith.constant 0 : index
    %c0_18 = arith.constant 0 : index
    %17 = vector.load %arg6[%c0_17, %c0_18] : memref<1x8xf32, #tpu.memory_space<vmem>>, vector<1x8xf32>
    %18 = vector.broadcast %17 : vector<1x8xf32> to vector<2x8xf32>
    %19 = arith.addf %16, %18 : vector<2x8xf32>
    %20 = arith.negf %19 : vector<2x8xf32>
    %21 = math.exp %20 : vector<2x8xf32>
    %cst_19 = arith.constant 1.000000e+00 : f32
    %22 = vector.broadcast %cst_19 : f32 to vector<2x8xf32>
    %23 = arith.addf %22, %21 : vector<2x8xf32>
    %24 = arith.divf %22, %23 : vector<2x8xf32>
    %25 = vector.shape_cast %24 : vector<2x8xf32> to vector<2x8x1xf32>
    %c0_20 = arith.constant 0 : index
    %c0_21 = arith.constant 0 : index
    %26 = vector.load %arg7[%c0_20, %c0_21] : memref<8x8xf32, #tpu.memory_space<vmem>>, vector<8x8xf32>
    %cst_22 = arith.constant dense<0.000000e+00> : vector<2x8xf32>
    %27 = tpu.matmul %7, %26, %cst_22 {dimension_numbers = #tpu.dot_dimension_numbers<[1], [0], [0], [1], [0, 0, 1, 1], [], []>} : vector<2x8xf32>, vector<8x8xf32>, vector<2x8xf32> -> vector<2x8xf32>
    %c0_23 = arith.constant 0 : index
    %c0_24 = arith.constant 0 : index
    %28 = vector.load %arg8[%c0_23, %c0_24] : memref<1x8xf32, #tpu.memory_space<vmem>>, vector<1x8xf32>
    %29 = vector.broadcast %28 : vector<1x8xf32> to vector<2x8xf32>
    %30 = arith.addf %27, %29 : vector<2x8xf32>
    %cst_25 = arith.constant 0.000000e+00 : f32
    %31 = vector.broadcast %cst_25 : f32 to vector<2x8xf32>
    %32 = arith.maximumf %30, %31 : vector<2x8xf32>
    %c0_26 = arith.constant 0 : index
    %c0_27 = arith.constant 0 : index
    %33 = vector.load %arg9[%c0_26, %c0_27] : memref<8x8xf32, #tpu.memory_space<vmem>>, vector<8x8xf32>
    %cst_28 = arith.constant dense<0.000000e+00> : vector<2x8xf32>
    %34 = tpu.matmul %32, %33, %cst_28 {dimension_numbers = #tpu.dot_dimension_numbers<[1], [0], [0], [1], [0, 0, 1, 1], [], []>} : vector<2x8xf32>, vector<8x8xf32>, vector<2x8xf32> -> vector<2x8xf32>
    %c0_29 = arith.constant 0 : index
    %c0_30 = arith.constant 0 : index
    %35 = vector.load %arg10[%c0_29, %c0_30] : memref<1x8xf32, #tpu.memory_space<vmem>>, vector<1x8xf32>
    %36 = vector.broadcast %35 : vector<1x8xf32> to vector<2x8xf32>
    %37 = arith.addf %34, %36 : vector<2x8xf32>
    %38 = arith.negf %37 : vector<2x8xf32>
    %39 = math.exp %38 : vector<2x8xf32>
    %cst_31 = arith.constant 1.000000e+00 : f32
    %40 = vector.broadcast %cst_31 : f32 to vector<2x8xf32>
    %41 = arith.addf %40, %39 : vector<2x8xf32>
    %42 = arith.divf %40, %41 : vector<2x8xf32>
    %43 = vector.shape_cast %42 : vector<2x8xf32> to vector<2x8x1xf32>
    %c0_32 = arith.constant 0 : index
    %c0_33 = arith.constant 0 : index
    %c0_34 = arith.constant 0 : index
    %44 = vector.load %arg1[%c0_32, %c0_33, %c0_34] : memref<2x8x256xf32, #tpu.memory_space<vmem>>, vector<2x8x256xf32>
    %45 = vector.broadcast %25 : vector<2x8x1xf32> to vector<2x8x256xf32>
    %46 = arith.mulf %44, %45 : vector<2x8x256xf32>
    %c0_35 = arith.constant 0 : index
    %c0_36 = arith.constant 0 : index
    %c0_37 = arith.constant 0 : index
    %47 = vector.load %arg2[%c0_35, %c0_36, %c0_37] : memref<2x8x256xf32, #tpu.memory_space<vmem>>, vector<2x8x256xf32>
    %48 = vector.broadcast %43 : vector<2x8x1xf32> to vector<2x8x256xf32>
    %49 = arith.mulf %47, %48 : vector<2x8x256xf32>
    %50 = arith.addf %46, %49 : vector<2x8x256xf32>
    %c0_38 = arith.constant 0 : index
    %c0_39 = arith.constant 0 : index
    %c0_40 = arith.constant 0 : index
    %51 = vector.load %arg11[%c0_38, %c0_39, %c0_40] : memref<2x8x256xf32, #tpu.memory_space<vmem>>, vector<2x8x256xf32>
    tpu.vector_store %arg11[%c0_38, %c0_39, %c0_40], %50 {strides = array<i32>} : memref<2x8x256xf32, #tpu.memory_space<vmem>>, vector<2x8x256xf32>,
    return
  }
  func.func @transform_0(%arg0: i32) -> (i32, i32, i32) {
    %c0_i32 = arith.constant 0 : i32
    %c0_i32_0 = arith.constant 0 : i32
    %c0_i32_1 = arith.constant 0 : i32
    return %arg0, %c0_i32, %c0_i32_0 : i32, i32, i32
  }
  func.func @transform_1(%arg0: i32) -> (i32, i32, i32) {
    %c0_i32 = arith.constant 0 : i32
    %c0_i32_0 = arith.constant 0 : i32
    %c0_i32_1 = arith.constant 0 : i32
    return %arg0, %c0_i32, %c0_i32_0 : i32, i32, i32
  }
  func.func @transform_2(%arg0: i32) -> (i32, i32) {
    %c0_i32 = arith.constant 0 : i32
    %c0_i32_0 = arith.constant 0 : i32
    %c0_i32_1 = arith.constant 0 : i32
    return %c0_i32, %c0_i32_0 : i32, i32
  }
  func.func @transform_3(%arg0: i32) -> (i32, i32) {
    %c0_i32 = arith.constant 0 : i32
    %c0_i32_0 = arith.constant 0 : i32
    %c0_i32_1 = arith.constant 0 : i32
    return %c0_i32, %c0_i32_0 : i32, i32
  }
  func.func @transform_4(%arg0: i32) -> (i32, i32) {
    %c0_i32 = arith.constant 0 : i32
    %c0_i32_0 = arith.constant 0 : i32
    %c0_i32_1 = arith.constant 0 : i32
    return %c0_i32, %c0_i32_0 : i32, i32
  }
  func.func @transform_5(%arg0: i32) -> (i32, i32) {
    %c0_i32 = arith.constant 0 : i32
    %c0_i32_0 = arith.constant 0 : i32
    %c0_i32_1 = arith.constant 0 : i32
    return %c0_i32, %c0_i32_0 : i32, i32
  }
  func.func @transform_6(%arg0: i32) -> (i32, i32) {
    %c0_i32 = arith.constant 0 : i32
    %c0_i32_0 = arith.constant 0 : i32
    %c0_i32_1 = arith.constant 0 : i32
    return %c0_i32, %c0_i32_0 : i32, i32
  }
  func.func @transform_7(%arg0: i32) -> (i32, i32) {
    %c0_i32 = arith.constant 0 : i32
    %c0_i32_0 = arith.constant 0 : i32
    %c0_i32_1 = arith.constant 0 : i32
    return %c0_i32, %c0_i32_0 : i32, i32
  }
  func.func @transform_8(%arg0: i32) -> (i32, i32) {
    %c0_i32 = arith.constant 0 : i32
    %c0_i32_0 = arith.constant 0 : i32
    %c0_i32_1 = arith.constant 0 : i32
    return %c0_i32, %c0_i32_0 : i32, i32
  }
  func.func @transform_9(%arg0: i32) -> (i32, i32) {
    %c0_i32 = arith.constant 0 : i32
    %c0_i32_0 = arith.constant 0 : i32
    %c0_i32_1 = arith.constant 0 : i32
    return %c0_i32, %c0_i32_0 : i32, i32
  }
  func.func @transform_10(%arg0: i32) -> (i32, i32, i32) {
    %c0_i32 = arith.constant 0 : i32
    %c0_i32_0 = arith.constant 0 : i32
    %c0_i32_1 = arith.constant 0 : i32
    return %arg0, %c0_i32, %c0_i32_0 : i32, i32, i32
  }
}

</mosaic_0001>

<bundles_post_ra>
// kernel: tpu_custom_call.1
= control target key start
LH: loop header
LB: loop body
LE: loop exit
PB: predicated region body
PF: predicated region fallthrough
CT: control target
= control target key end

     0   :  { %15 = vsyncpa [#allocation3], 0  ;;  %s912_s0 = inlined_call_operand.hbm [shape: f32[2,8,256], index: 0, kind: input, shape index: {}]   ;;  %s913_s1 = inlined_call_operand.hbm [shape: f32[2,8,256], index: 1, kind: input, shape index: {}]   ;;  %s914_s2 = inlined_call_operand.hbm [shape: f32[8,8], index: 2, kind: input, shape index: {}]   ;;  %s915_s3 = inlined_call_operand.vmem [shape: f32[1,8], index: 3, kind: input, shape index: {}]   ;;  %s916_s4 = inlined_call_operand.vmem [shape: f32[8,8], index: 4, kind: input, shape index: {}]   ;;  %s917_s5 = inlined_call_operand.vmem [shape: f32[1,8], index: 5, kind: input, shape index: {}]   ;;  %s918_s6 = inlined_call_operand.vmem [shape: f32[8,8], index: 6, kind: input, shape index: {}]   ;;  %s919_s7 = inlined_call_operand.hbm [shape: f32[1,8], index: 7, kind: input, shape index: {}]   ;;  %s920_s8 = inlined_call_operand.vmem [shape: f32[8,8], index: 8, kind: input, shape index: {}]   ;;  %s921_s9 = inlined_call_operand.vmem [shape: f32[1,8], index: 9, kind: input, shape index: {}]   ;;  %s922_s10 = inlined_call_operand.hbm [shape: f32[2,8,256], index: 10, kind: output, shape index: {}]  }
   0x1   :  { %16 = vsyncpa [#allocation6], 0 }
   0x2   :  { %17 = vsyncpa [#allocation9], 0 }
   0x3   :  { %18 = vsyncpa [#allocation4], 0  ;;  %s709_s13 = smov [#allocation5]   ;;  %s710_s15 = smov [#allocation2]  }
   0x4   :  { %s36_s14 = sshll.u32 %s709_s13, 4  ;;  %s24_s16 = sshll.u32 %s710_s15, 4  ;;  %s37_s14 = int_to_ptr.vmem [resolvable:$true] %s36_s14  ;;  %s773_s16 = int_to_ptr.vmem [resolvable:$true] %s24_s16 }
   0x5   :  { %s591_s19 = scalar_lea.hbm %s913_s1, 512 }
   0x6   :  { %p592_p0 = scmp.ne.s32.totalorder %s913_s1, %s591_s19  ;;  %p595_p1 = scmp.lt.u32.totalorder %s591_s19, %s913_s1 }
   0x8   :  { %p597_p2 = pnand %p595_p1, %p592_p0 }
   0xa   :  { %600 = shalt.err (!%p597_p2)
}
   0xb   :  { %s601_s24 = scalar_lea.vmem %s37_s14, 512  ;;  %p606_p4 = scmp.lt.s32.totalorder %s37_s14, %s37_s14 }
   0xc   :  { %p602_p3 = scmp.ne.s32.totalorder %s37_s14, %s601_s24  ;;  %p607_p5 = scmp.lt.s32.totalorder %s601_s24, %s601_s24 }
   0xe   :  { %p608_p6 = por %p607_p5, %p606_p4 }
  0x10   :  { %p609_p7 = pnand %p608_p6, %p602_p3 }
  0x12   :  { %612 = shalt.err (!%p609_p7)
}
  0x13   :  { %s711_s25 = smov 256   ;;  %s712_s26 = smov 16  }
  0x14   :  { %42 = dma.hbm_to_vmem [thread:$0]  %s913_s1, 512, %s37_s14, [#allocation6], %s711_s25, %s711_s25, %s712_s26  }
  0x15   :  { %s613_s11 = scalar_lea.hbm %s912_s0, 512 }
  0x16   :  { %p614_p8 = scmp.ne.s32.totalorder %s912_s0, %s613_s11  ;;  %p617_p9 = scmp.lt.u32.totalorder %s613_s11, %s912_s0 }
  0x18   :  { %p619_p10 = pnand %p617_p9, %p614_p8 }
  0x1a   :  { %622 = shalt.err (!%p619_p10)
}
  0x1b   :  { %s623_s18 = scalar_lea.vmem %s773_s16, 512  ;;  %p628_p12 = scmp.lt.s32.totalorder %s773_s16, %s773_s16 }
  0x1c   :  { %p624_p11 = scmp.ne.s32.totalorder %s773_s16, %s623_s18  ;;  %p629_p13 = scmp.lt.s32.totalorder %s623_s18, %s623_s18 }
  0x1e   :  { %p630_p0 = por %p629_p13, %p628_p12 }
  0x20   :  { %p631_p1 = pnand %p630_p0, %p624_p11 }
  0x22   :  { %634 = shalt.err (!%p631_p1)
}
  0x23   :  { %30 = dma.hbm_to_vmem [thread:$0]  %s912_s0, 512, %s773_s16, [#allocation3], %s711_s25, %s711_s25, %s712_s26  }
  0x24   :  { %s713_s19 = smov [#allocation7]   ;;  %s714_s21 = smov [#allocation8]  }
  0x25   :  { %s49_s20 = sshll.u32 %s713_s19, 4  ;;  %s67_s22 = sshll.u32 %s714_s21, 4  ;;  %s50_s20 = int_to_ptr.vmem [resolvable:$true] %s49_s20  ;;  %s68_s22 = int_to_ptr.vmem [resolvable:$true] %s67_s22 }
  0x26   :  { %s635_s27 = scalar_lea.hbm %s914_s2, 128 }
  0x27   :  { %p636_p2 = scmp.ne.s32.totalorder %s914_s2, %s635_s27  ;;  %p639_p3 = scmp.lt.u32.totalorder %s635_s27, %s914_s2 }
  0x29   :  { %p641_p4 = pnand %p639_p3, %p636_p2 }
  0x2b   :  { %644 = shalt.err (!%p641_p4)
}
  0x2c   :  { %s645_s0 = scalar_lea.vmem %s50_s20, 128  ;;  %p650_p6 = scmp.lt.s32.totalorder %s50_s20, %s50_s20 }
  0x2d   :  { %p646_p5 = scmp.ne.s32.totalorder %s50_s20, %s645_s0  ;;  %p651_p7 = scmp.lt.s32.totalorder %s645_s0, %s645_s0 }
  0x2f   :  { %p652_p8 = por %p651_p7, %p650_p6 }
  0x31   :  { %p653_p9 = pnand %p652_p8, %p646_p5 }
  0x33   :  { %656 = shalt.err (!%p653_p9)
}
  0x34   :  { %52 = dma.hbm_to_vmem [thread:$0]  %s914_s2, 128, %s50_s20, [#allocation6]  }
  0x35   :  { %s657_s17 = scalar_lea.hbm %s919_s7, 16 }
  0x36   :  { %p658_p10 = scmp.ne.s32.totalorder %s919_s7, %s657_s17  ;;  %p661_p11 = scmp.lt.u32.totalorder %s657_s17, %s919_s7 }
  0x38   :  { %p663_p12 = pnand %p661_p11, %p658_p10 }
  0x3a   :  { %666 = shalt.err (!%p663_p12)
}
  0x3b   :  { %s667_s21 = scalar_lea.vmem %s68_s22, 16  ;;  %s671_s23 = scalar_lea.vmem %s68_s22, 32 }
  0x3c   :  { %p668_p13 = scmp.ne.s32.totalorder %s68_s22, %s667_s21  ;;  %p672_p0 = scmp.lt.s32.totalorder %s68_s22, %s68_s22 }
  0x3d   :  { %p673_p1 = scmp.lt.s32.totalorder %s671_s23, %s667_s21 }
  0x3f   :  { %p674_p2 = por %p673_p1, %p672_p0 }
  0x41   :  { %p675_p3 = pnand %p674_p2, %p668_p13 }
  0x43   :  { %678 = shalt.err (!%p675_p3)
}
  0x44   :  { %70 = dma.hbm_to_vmem [thread:$0]  %s919_s7, 16, %s68_s22, [#allocation9]  }
  0x45   :  { %701 = dma.done.wait [#allocation3], 512  }
  0x46   :  { %702 = vsyncadd [#allocation3], 4294966784 }
  0x47   :  { %703 = dma.done.wait [#allocation6], 640  }
  0x48   :  { %704 = vsyncadd [#allocation6], 4294966656 }
  0x49   :  { %705 = dma.done.wait [#allocation9], 16  }
  0x4a   :  { %706 = vsyncadd [#allocation9], 4294967280  ;;  %v834_v0 = vld [vmem:[#allocation5] sm:$0xff]  ;;  %v836_v1 = vld [vmem:[#allocation5 + $0x8] sm:$0xff]  ;;  %v715_v13 = vmov 0.0   ;;  %vm716_vm0 = vmmov 0   ;;  %v121_v14 = vlaneseq }
  0x4b   :  { %v838_v2 = vld [vmem:[#allocation2] sm:$0xff]  ;;  %v103_v3 = vadd.f32 %v836_v1, %v834_v0  ;;  %v842_v4 = vld [vmem:[#allocation2 + $0x8] sm:$0xff]  ;;  %v844_v5 = vld [vmem:[#allocation5 + $0x10] sm:$0xff]  ;;  %554 = vmatprep.subr.mxu0 %v715_v13  ;;  %556 = vmatprep.mubr.msk.f32.mxu0 %vm716_vm0, %v715_v13  ;;  %vm131_vm1 = vcmask 1041409   ;;  %vm133_vm2 = vcmask 64512  }
  0x4c   :  { %v846_v6 = vld [vmem:[#allocation5 + $0x18] sm:$0xff]  ;;  %v91_v7 = vadd.f32 %v842_v4, %v838_v2  ;;  %v850_v8 = vld [vmem:[#allocation2 + $0x10] sm:$0xff]  ;;  %v111_v12 = vld [vmem:[#allocation7] sm:$0xff]  ;;  %559 = vmatprep.subr.mxu1 %v715_v13  ;;  %561 = vmatprep.mubr.msk.f32.mxu1 %vm716_vm0, %v715_v13  ;;  %v122_v15 = vand.u32 127, %v121_v14  ;;  %v860_v16 = vshrl.u32 %v121_v14, 7 }
  0x4d   :  { %v852_v9 = vld [vmem:[#allocation2 + $0x18] sm:$0xff]  ;;  %104 = vadd.xlane.f32.xlu1 %v103_v3  ;;  %v106_v10 = vadd.f32 %v846_v6, %v844_v5  ;;  %555 = vmatpush3.msra.mxu0 %v111_v12  ;;  %v308_v28 = vld [vmem:[%s918_s6] sm:$0xff]  ;;  %v541_v38 = vld [vmem:[#allocation8] ss:$0 sm:$0xff] }
  0x4e   :  { %92 = vadd.xlane.f32.xlu0 %v91_v7  ;;  %v94_v11 = vadd.f32 %v852_v9, %v850_v8  ;;  %564 = vmatprep.subr.mxu0 %v715_v13  ;;  %v125_v19 = vsub.s32 %v122_v15, %v860_v16  ;;  %v207_v33 = vld [vmem:[%s916_s4] sm:$0xff]  ;;  %v303_v59 = vsub.s32 1, %v860_v16  ;;  %v296_v60 = vsub.s32 0, %v860_v16 }
  0x4f   :  { %560 = vmatpush3.msra.mxu1 %v207_v33  ;;  %v536_v34 = vld [vmem:[%s915_s3] ss:$0 sm:$0xff] }
  0x50   :  { %569 = vmatprep.subr.mxu1 %v715_v13  ;;  %v400_v40 = vld [vmem:[%s920_s8] sm:$0xff] }
  0x51   :  { %107 = vadd.xlane.f32.xlu1 %v106_v10  ;;  %v538_v45 = vld [vmem:[%s917_s5] ss:$0 sm:$0xff]  ;;  %s717_s5 = smov [#allocation10]  }
  0x52   :  { %95 = vadd.xlane.f32.xlu0 %v94_v11  ;;  %v543_v49 = vld [vmem:[%s921_s9] ss:$0 sm:$0xff]  ;;  %s522_s9 = sshll.u32 %s717_s5, 4  ;;  %s523_s9 = int_to_ptr.vmem [resolvable:$true] %s522_s9 }
  0x53   :  { %s679_s0 = scalar_lea.vmem %s523_s9, 512  ;;  %p684_p5 = scmp.lt.s32.totalorder %s523_s9, %s523_s9 }
  0x54   :  { %p680_p4 = scmp.ne.s32.totalorder %s523_s9, %s679_s0  ;;  %p685_p6 = scmp.lt.s32.totalorder %s679_s0, %s679_s0 }
  0x56   :  { %p686_p7 = por %p685_p6, %p684_p5 }
  0x58   :  { %p687_p8 = pnand %p686_p7, %p680_p4 }
  0xda   :  { %v105_v17 = vpop.xlane.xlu1 %104 }
  0xdb   :  { %v93_v18 = vpop.xlane.xlu0 %92  ;;  %v109_v23 = vmul.f32 0.00390625, %v105_v17 }
  0xdc   :  { %v97_v20 = vmul.f32 0.00390625, %v93_v18 }
  0xdd   :  { %v321_v29 = vrot.slane %v109_v23, %v125_v19 }
  0xde   :  { %v108_v21 = vpop.xlane.xlu1 %107  ;;  %v126_v26 = vrot.slane %v97_v20, %v125_v19 }
  0xdf   :  { %v96_v22 = vpop.xlane.xlu0 %95  ;;  %v110_v24 = vmul.f32 0.00390625, %v108_v21 }
  0xe0   :  { %v98_v25 = vmul.f32 0.00390625, %v96_v22 }
  0xe1   :  { %v325_v30 = vrot.slane %v110_v24, %v125_v19 }
  0xe2   :  { %v130_v27 = vrot.slane %v98_v25, %v125_v19 }
  0xe3   :  { %v326_v32 = vsel %vm131_vm1, %v325_v30, %v321_v29 }
  0xe4   :  { %v132_v31 = vsel %vm131_vm1, %v130_v27, %v126_v26 }
  0xe5   :  { %557 = vmatmul.mubr.msk.f32.vlgmr.msra.gmra.mrb[0].mxu0 %vm133_vm2, %v132_v31 }
  0xe6   :  { %565 = vmatpush3.msra.mxu0 %v308_v28  ;;  %566 = vmatprep.mubr.msk.f32.mxu0 %vm716_vm0, %v715_v13 }
  0xe9   :  { %567 = vmatmul.mubr.msk.f32.vlgmr.msra.gmra.mrb[2].mxu0 %vm133_vm2, %v326_v32 }
 0x1b8   :  { %v202_v35 = vpop.f32.mrb[0].mxu0 }
 0x1b9   :  { %v203_v36 = vadd.f32 %v536_v34, %v202_v35  ;;  %v558_v37 = vpop.f32.mrb[1].mxu0 }
 0x1bb   :  { %v206_v39 = vmax.f32 %v203_v36, 0.0 }
 0x1bc   :  { %v395_v41 = vpop.f32.mrb[2].mxu0 }
 0x1bd   :  { %v396_v42 = vadd.f32 %v541_v38, %v395_v41  ;;  %562 = vmatmul.mubr.msk.f32.vlgmr.msra.gmra.mrb[0].mxu1 %vm133_vm2, %v206_v39  ;;  %v568_v43 = vpop.f32.mrb[3].mxu0 }
 0x1be   :  { %570 = vmatpush3.msra.mxu1 %v400_v40  ;;  %571 = vmatprep.mubr.msk.f32.mxu1 %vm716_vm0, %v715_v13 }
 0x1bf   :  { %v399_v44 = vmax.f32 %v396_v42, 0.0 }
 0x1c1   :  { %572 = vmatmul.mubr.msk.f32.vlgmr.msra.gmra.mrb[2].mxu1 %vm133_vm2, %v399_v44 }
 0x290   :  { %v284_v46 = vpop.f32.mrb[0].mxu1 }
 0x291   :  { %v285_v47 = vadd.f32 %v538_v45, %v284_v46  ;;  %v563_v48 = vpop.f32.mrb[1].mxu1 }
 0x293   :  { %v540_v50 = vmul.f32 -1.442695, %v285_v47 }
 0x294   :  { %v477_v51 = vpop.f32.mrb[2].mxu1 }
 0x295   :  { %583 = vpow2.f32 %v540_v50  ;;  %v478_v52 = vadd.f32 %v543_v49, %v477_v51  ;;  %v573_v53 = vpop.f32.mrb[3].mxu1 }
 0x297   :  { %v545_v54 = vmul.f32 -1.442695, %v478_v52 }
 0x299   :  { %585 = vpow2.f32 %v545_v54 }
 0x29f   :  { %v584_v55 = vpop.eup %583 }
 0x2a0   :  { %v291_v56 = vadd.f32 1.0, %v584_v55 }
 0x2a2   :  { %587 = vrcp.f32 %v291_v56 }
 0x2a3   :  { %v586_v57 = vpop.eup %585 }
 0x2a4   :  { %v484_v58 = vadd.f32 1.0, %v586_v57 }
 0x2a6   :  { %589 = vrcp.f32 %v484_v58 }
 0x2ac   :  { %v588_v61 = vpop.eup %587 }
 0x2ad   :  { %v304_v62 = vrot.slane %v588_v61, %v303_v59  ;;  %v297_v63 = vrot.slane %v588_v61, %v296_v60 }
 0x2af   :  { %306 = vbcast.lane.b32.xlu1 %v304_v62, 256  ;;  %299 = vbcast.lane.b32.xlu0 %v297_v63, 256 }
 0x2b0   :  { %v590_v3 = vpop.eup %589 }
 0x2b1   :  { %v490_v7 = vrot.slane %v590_v3, %v296_v60  ;;  %v497_v10 = vrot.slane %v590_v3, %v303_v59 }
 0x2b3   :  { %492 = vbcast.lane.b32.xlu1 %v490_v7, 256 }
 0x2b7   :  { %499 = vbcast.lane.b32.xlu1 %v497_v10, 256 }
 0x321   :  { %v307_v11 = vpop.permute.xlu1 %306  ;;  %v300_v12 = vpop.permute.xlu0 %299 }
 0x322   :  { %v501_v14 = vmul.f32 %v300_v12, %v838_v2  ;;  %v502_v15 = vmul.f32 %v300_v12, %v842_v4  ;;  %v503_v21 = vmul.f32 %v307_v11, %v850_v8  ;;  %v504_v22 = vmul.f32 %v307_v11, %v852_v9 }
 0x325   :  { %v493_v13 = vpop.permute.xlu1 %492 }
 0x326   :  { %v505_v17 = vmul.f32 %v493_v13, %v834_v0  ;;  %v506_v16 = vmul.f32 %v493_v13, %v836_v1 }
 0x328   :  { %v509_v18 = vadd.f32 %v505_v17, %v501_v14  ;;  %v510_v19 = vadd.f32 %v506_v16, %v502_v15 }
 0x329   :  { %v500_v20 = vpop.permute.xlu1 %499 }
 0x32a   :  { %513 = vst [vmem:[#allocation10] sm:$0xff] %v509_v18  ;;  %514 = vst [vmem:[#allocation10 + $0x8] sm:$0xff] %v510_v19  ;;  %v507_v23 = vmul.f32 %v500_v20, %v844_v5  ;;  %v508_v2 = vmul.f32 %v500_v20, %v846_v6 }
 0x32c   :  { %v511_v4 = vadd.f32 %v507_v23, %v503_v21  ;;  %v512_v24 = vadd.f32 %v508_v2, %v504_v22 }
 0x32e   :  { %515 = vst [vmem:[#allocation10 + $0x10] sm:$0xff] %v511_v4  ;;  %516 = vst [vmem:[#allocation10 + $0x18] sm:$0xff] %v512_v24 }
 0x32f   :  { %690 = shalt.err (!%p687_p8)
}
 0x330   :  { %s691_s13 = scalar_lea.hbm %s922_s10, 512 }
 0x331   :  { %p692_p9 = scmp.ne.s32.totalorder %s922_s10, %s691_s13  ;;  %p695_p10 = scmp.lt.u32.totalorder %s691_s13, %s922_s10 }
 0x333   :  { %p697_p11 = pnand %p695_p10, %p692_p9 }
 0x335   :  { %700 = shalt.err (!%p697_p11)
}
 0x336   :  { %528 = dma.vmem_to_hbm [thread:$0]  %s523_s9, 512, %s922_s10, [#allocation4], %s711_s25, %s711_s25, %s712_s26  }
 0x337   :  { %707 = dma.done.wait [#allocation4], 512  }
 0x338   :  { %708 = vsyncadd [#allocation4], 4294966784 }
 0x339   :  { %532 = vsyncpa [#allocation3], 1 }
 0x33a   :  { %533 = vsyncpa [#allocation6], 1 }
 0x33b   :  { %534 = vsyncpa [#allocation9], 1 }
 0x33c   :  { %535 = vsyncpa [#allocation4], 1 }

</bundles_post_ra>
